<compile_context>
chip_gen: v7x
topology: tpu7x:2x2x1
jax: 0.10.0
libtpu: 0.0.40
codegen_flags: <defaults>
</compile_context>

<pallas_src>
import functools
import numpy as np
import jax
import jax.numpy as jnp
from jax import lax
from jax.experimental import pallas as pl
from jax.experimental.pallas import tpu as pltpu


# ----------------------------- Pallas kernel -----------------------------

def _patch_merging_kernel(x_ref, w_ref, cb_ref, o_ref, *, eps):
    # x_ref : (tr, 2, WH, 2C)   -- axis1 = row parity, last axis = (col parity, C)
    # w_ref : (2, 2C, N) bf16   -- gamma-folded reduction weight halves, K-major
    # cb_ref: (2, N)  f32       -- row 0 = colsum(W_fold) = gamma @ W^T, row 1 = beta @ W^T
    # o_ref : (tr*WH, N)
    x = x_ref[...]
    tr, _, wh, c2 = x.shape
    rows = tr * wh

    # Parity planes: xa holds channels [x0 | x2], xb holds [x1 | x3].
    # Major-axis slice + major-dim merge -> layout-trivial (wh is padded to a
    # sublane multiple on the host).
    xa = x[:, 0].reshape(rows, c2)
    xb = x[:, 1].reshape(rows, c2)

    # LayerNorm statistics over the full 4C channels (split across both planes),
    # accumulated in f32 via the one-pass E[x^2] - mu^2 form.
    xa_f = xa.astype(jnp.float32)
    xb_f = xb.astype(jnp.float32)
    inv_c4 = 1.0 / (2 * c2)
    s1 = (jnp.sum(xa_f, axis=-1, keepdims=True)
          + jnp.sum(xb_f, axis=-1, keepdims=True))
    s2 = (jnp.sum(xa_f * xa_f, axis=-1, keepdims=True)
          + jnp.sum(xb_f * xb_f, axis=-1, keepdims=True))
    mu = s1 * inv_c4
    var = jnp.maximum(s2 * inv_c4 - mu * mu, 0.0)
    rstd = lax.rsqrt(var + eps)

    # Raw parity planes straight to the MXU (bf16 inputs, f32 accumulation):
    #   ymm = [xa | xb] @ W_fold  ==  xa @ Wa + xb @ Wb
    ymm = lax.dot_general(xa.astype(jnp.bfloat16), w_ref[0],
                          (((1,), (0,)), ((), ())),
                          preferred_element_type=jnp.float32)
    ymm = ymm + lax.dot_general(xb.astype(jnp.bfloat16), w_ref[1],
                                (((1,), (0,)), ((), ())),
                                preferred_element_type=jnp.float32)

    cb = cb_ref[...]
    colsum = cb[0:1, :]          # (1, N)   sum_k gamma[k] * W^T[k, :]
    bias = cb[1:2, :]            # (1, N)   beta @ W^T
    y = (ymm - mu * colsum) * rstd + bias
    o_ref[...] = y.astype(o_ref.dtype)


# ----------------------------- host-side helpers -----------------------------

def _choose_row_tile(m_rows, wh, c2, n_out, in_itemsize, out_itemsize,
                     tile_budget_bytes=8 << 20, target_steps=8):
    """Row tile (in units of B*H/2 rows) targeting >= target_steps pipeline steps
    while keeping the true per-step VMEM footprint under tile_budget_bytes."""
    per_row = wh * (
        2 * (2 * c2) * in_itemsize    # input block, double-buffered (both parity planes)
        + 2 * n_out * out_itemsize    # output block, double-buffered
        + 2 * c2 * 4                  # f32 stats copies of both planes
        + 2 * c2 * 2                  # bf16 MXU operands
        + n_out * 4                   # f32 matmul accumulator
    )
    tr_cap = max(1, int(tile_budget_bytes // per_row))
    tr_steps = max(1, (m_rows + target_steps - 1) // target_steps)
    tr = max(1, min(tr_cap, tr_steps, m_rows))
    return tr, per_row


def prepare_patch_merging_params(gamma, beta, weight, dim):
    """Convert PyTorch-layout PatchMerging parameters into the kernel layout.

    gamma, beta : (4*dim,)        nn.LayerNorm(4*dim) weight / bias
    weight      : (2*dim, 4*dim)  nn.Linear(4*dim, 2*dim, bias=False).weight

    The kernel's natural channel order is [x0 | x2 | x1 | x3]; PyTorch's is
    [x0 | x1 | x2 | x3].  gamma is folded into the weight rows (f32) and the
    rows are permuted so the kernel reproduces PyTorch exactly.  The LayerNorm
    shift terms are folded into two precomputed (1, N) vectors.
    """
    c = dim
    c2 = 2 * c
    perm = np.concatenate([np.arange(0, c), np.arange(2 * c, 3 * c),
                           np.arange(c, 2 * c), np.arange(3 * c, 4 * c)])
    g = jnp.asarray(gamma, jnp.float32)                 # (4C,)
    b = jnp.asarray(beta, jnp.float32)                  # (4C,)
    w_t = jnp.asarray(weight, jnp.float32).T            # (4C, N), K-major

    w_fold = (g[:, None] * w_t)[perm]                   # (4C, N), gamma folded + permuted
    colsum = jnp.sum(w_fold, axis=0, keepdims=True)     # (1, N) == gamma @ W^T (perm-invariant)
    bias = b[None, :] @ w_t                             # (1, N) == beta  @ W^T (perm-invariant)

    w_packed = jnp.stack([w_fold[:c2], w_fold[c2:]]).astype(jnp.bfloat16)   # (2, 2C, N)
    cb = jnp.concatenate([colsum, bias], axis=0).astype(jnp.float32)        # (2, N)
    return dict(w=w_packed, cb=cb)


def patch_merging_forward(x, params, input_resolution, *, eps=1e-5):
    h, w = input_resolution
    b, seq_len, c = x.shape
    assert seq_len == h * w, 'input feature has wrong size'
    assert h % 2 == 0 and w % 2 == 0, f'x size ({h}*{w}) are not even.'

    wh = w // 2
    c2 = 2 * c
    n_out = 2 * c
    m_rows = b * (h // 2)

    # Free (row-major compatible) relayout: (B, H*W, C) -> (B*H/2, 2, W/2, 2C).
    xr = x.reshape(m_rows, 2, wh, c2)

    # Keep the in-kernel plane flatten and the output store layout-free for
    # non-sublane-aligned Swin widths (W/2 = 28/14/7 ...) by padding W/2 to a
    # multiple of 8.  Padded rows are sliced off after the kernel.
    # TODO(synk): padding costs one extra HBM pass when it triggers; a 3-D
    # in-kernel contraction would avoid it, not needed for aligned widths.
    wh_p = ((wh + 7) // 8) * 8
    if wh_p != wh:
        xr = jnp.pad(xr, ((0, 0), (0, 0), (0, wh_p - wh), (0, 0)))

    in_itemsize = x.dtype.itemsize
    out_itemsize = x.dtype.itemsize
    tr, per_row = _choose_row_tile(m_rows, wh_p, c2, n_out, in_itemsize, out_itemsize)

    n_steps = (m_rows + tr - 1) // tr
    m_pad = n_steps * tr
    if m_pad != m_rows:                       # allow non-divisor tiles via row padding
        xr = jnp.pad(xr, ((0, m_pad - m_rows), (0, 0), (0, 0), (0, 0)))

    # Honest VMEM budget: tile-dependent bytes + double-buffered constant operands.
    fixed_bytes = 2 * (params['w'].size * params['w'].dtype.itemsize
                       + params['cb'].size * params['cb'].dtype.itemsize)
    vmem_limit = int(min(max(32 << 20, 2 * (tr * per_row + fixed_bytes)), 64 << 20))

    kernel = functools.partial(_patch_merging_kernel, eps=eps)
    out2d = pl.pallas_call(
        kernel,
        out_shape=jax.ShapeDtypeStruct((m_pad * wh_p, n_out), x.dtype),
        grid=(n_steps,),
        in_specs=[
            pl.BlockSpec((tr, 2, wh_p, c2), lambda i: (i, 0, 0, 0)),   # x block
            pl.BlockSpec((2, c2, n_out), lambda i: (0, 0, 0)),         # folded weight halves
            pl.BlockSpec((2, n_out), lambda i: (0, 0)),                # colsum / bias
        ],
        out_specs=pl.BlockSpec((tr * wh_p, n_out), lambda i: (i, 0)),
        compiler_params=pltpu.CompilerParams(
            dimension_semantics=("parallel",),
            vmem_limit_bytes=vmem_limit),
    )(xr, params['w'], params['cb'])

    out = out2d.reshape(m_pad, wh_p, n_out)
    if m_pad != m_rows or wh_p != wh:
        out = out[:m_rows, :wh, :]
    return out.reshape(b, (h // 2) * (w // 2), n_out)


# ----------------------------- pure-JAX reference -----------------------------

def patch_merging_ref(x, gamma, beta, weight, input_resolution, eps=1e-5):
    """Direct transcription of the PyTorch forward (f32)."""
    h, w = input_resolution
    b, _, c = x.shape
    xr = x.reshape(b, h, w, c)
    x0 = xr[:, 0::2, 0::2, :]
    x1 = xr[:, 1::2, 0::2, :]
    x2 = xr[:, 0::2, 1::2, :]
    x3 = xr[:, 1::2, 1::2, :]
    xc = jnp.concatenate([x0, x1, x2, x3], axis=-1).reshape(b, -1, 4 * c)
    mu = jnp.mean(xc, axis=-1, keepdims=True)
    var = jnp.mean((xc - mu) ** 2, axis=-1, keepdims=True)
    xn = (xc - mu) / jnp.sqrt(var + eps) * gamma + beta
    return xn @ weight.T


# ----------------------------- main -----------------------------

if __name__ == "__main__":
    B = 2
    H, W = 16, 16
    DIM = 64          # LayerNorm width 4*DIM = 256, output width 2*DIM = 128 (lane-dense)

    key = jax.random.PRNGKey(0)
    kx, kg, kb, kw = jax.random.split(key, 4)
    x = jax.random.normal(kx, (B, H * W, DIM), jnp.float32)

    # PyTorch-layout parameters of PatchMerging((H, W), DIM)
    gamma = 1.0 + 0.02 * jax.random.normal(kg, (4 * DIM,), jnp.float32)
    beta = 0.02 * jax.random.normal(kb, (4 * DIM,), jnp.float32)
    weight = 0.05 * jax.random.normal(kw, (2 * DIM, 4 * DIM), jnp.float32)

    params = prepare_patch_merging_params(gamma, beta, weight, DIM)

    fwd = jax.jit(functools.partial(patch_merging_forward, input_resolution=(H, W)))
    out = jax.block_until_ready(fwd(x, params))

    assert out.shape == (B, (H // 2) * (W // 2), 2 * DIM)
    assert out.dtype == jnp.float32
    assert bool(jnp.all(jnp.isfinite(out)))

    # Correctness vs. pure-JAX f32 reference (tolerance for bf16 matmul inputs).
    ref = patch_merging_ref(x, gamma, beta, weight, (H, W))
    np.testing.assert_allclose(np.asarray(out), np.asarray(ref), rtol=2e-2, atol=2e-2)

    print("KERNEL_OK")
</pallas_src>

<mosaic_0001>
module attributes {stable_mosaic.version = 11 : i64} {
  func.func @_patch_merging_kernel(%arg0: i32, %arg1: memref<2x2x8x128xf32, #tpu.memory_space<vmem>>, %arg2: memref<2x128x128xbf16, #tpu.memory_space<vmem>>, %arg3: memref<2x128xf32, #tpu.memory_space<vmem>>, %arg4: memref<16x128xf32, #tpu.memory_space<vmem>>) attributes {dimension_semantics = [#tpu.dimension_semantics<parallel>], iteration_bounds = array<i64: 8>, scalar_prefetch = 0 : i64, scratch_operands = 0 : i64, tpu.core_type = #tpu.core_type<tc>, window_params = [{transform_indices = @transform_0, window_bounds = array<i64: 2, 2, 8, 128>}, {pipeline_mode = #tpu.pipeline_mode<synchronous>, transform_indices = @transform_1, window_bounds = array<i64: 2, 128, 128>}, {pipeline_mode = #tpu.pipeline_mode<synchronous>, transform_indices = @transform_2, window_bounds = array<i64: 2, 128>}, {transform_indices = @transform_3, window_bounds = array<i64: 16, 128>}]} {
    %c0 = arith.constant 0 : index
    %c0_0 = arith.constant 0 : index
    %c0_1 = arith.constant 0 : index
    %c0_2 = arith.constant 0 : index
    %0 = vector.load %arg1[%c0, %c0_0, %c0_1, %c0_2] : memref<2x2x8x128xf32, #tpu.memory_space<vmem>>, vector<2x2x8x128xf32>
    %1 = vector.extract_strided_slice %0 {offsets = [0, 0, 0, 0], sizes = [2, 1, 8, 128], strides = [1, 1, 1, 1]} : vector<2x2x8x128xf32> to vector<2x1x8x128xf32>
    %2 = vector.shape_cast %1 : vector<2x1x8x128xf32> to vector<2x8x128xf32>
    %3 = vector.shape_cast %2 : vector<2x8x128xf32> to vector<16x128xf32>
    %4 = vector.extract_strided_slice %0 {offsets = [0, 1, 0, 0], sizes = [2, 1, 8, 128], strides = [1, 1, 1, 1]} : vector<2x2x8x128xf32> to vector<2x1x8x128xf32>
    %5 = vector.shape_cast %4 : vector<2x1x8x128xf32> to vector<2x8x128xf32>
    %6 = vector.shape_cast %5 : vector<2x8x128xf32> to vector<16x128xf32>
    %cst = arith.constant dense<0.000000e+00> : vector<16xf32>
    %7 = vector.multi_reduction <add>, %3, %cst [1] : vector<16x128xf32> to vector<16xf32>
    %8 = vector.shape_cast %7 : vector<16xf32> to vector<16x1xf32>
    %cst_3 = arith.constant dense<0.000000e+00> : vector<16xf32>
    %9 = vector.multi_reduction <add>, %6, %cst_3 [1] : vector<16x128xf32> to vector<16xf32>
    %10 = vector.shape_cast %9 : vector<16xf32> to vector<16x1xf32>
    %11 = arith.addf %8, %10 : vector<16x1xf32>
    %12 = arith.mulf %3, %3 : vector<16x128xf32>
    %cst_4 = arith.constant dense<0.000000e+00> : vector<16xf32>
    %13 = vector.multi_reduction <add>, %12, %cst_4 [1] : vector<16x128xf32> to vector<16xf32>
    %14 = vector.shape_cast %13 : vector<16xf32> to vector<16x1xf32>
    %15 = arith.mulf %6, %6 : vector<16x128xf32>
    %cst_5 = arith.constant dense<0.000000e+00> : vector<16xf32>
    %16 = vector.multi_reduction <add>, %15, %cst_5 [1] : vector<16x128xf32> to vector<16xf32>
    %17 = vector.shape_cast %16 : vector<16xf32> to vector<16x1xf32>
    %18 = arith.addf %14, %17 : vector<16x1xf32>
    %cst_6 = arith.constant 3.906250e-03 : f32
    %19 = vector.broadcast %cst_6 : f32 to vector<16x1xf32>
    %20 = arith.mulf %11, %19 : vector<16x1xf32>
    %cst_7 = arith.constant 3.906250e-03 : f32
    %21 = vector.broadcast %cst_7 : f32 to vector<16x1xf32>
    %22 = arith.mulf %18, %21 : vector<16x1xf32>
    %23 = arith.mulf %20, %20 : vector<16x1xf32>
    %24 = arith.subf %22, %23 : vector<16x1xf32>
    %cst_8 = arith.constant 0.000000e+00 : f32
    %25 = vector.broadcast %cst_8 : f32 to vector<16x1xf32>
    %26 = arith.maximumf %24, %25 : vector<16x1xf32>
    %cst_9 = arith.constant 9.99999974E-6 : f32
    %27 = vector.broadcast %cst_9 : f32 to vector<16x1xf32>
    %28 = arith.addf %26, %27 : vector<16x1xf32>
    %29 = math.rsqrt %28 : vector<16x1xf32>
    %30 = arith.truncf %3 : vector<16x128xf32> to vector<16x128xbf16>
    %c0_10 = arith.constant 0 : index
    %c0_11 = arith.constant 0 : index
    %c0_12 = arith.constant 0 : index
    %31 = vector.load %arg2[%c0_10, %c0_11, %c0_12] : memref<2x128x128xbf16, #tpu.memory_space<vmem>>, vector<1x128x128xbf16>
    %32 = vector.shape_cast %31 : vector<1x128x128xbf16> to vector<128x128xbf16>
    %cst_13 = arith.constant dense<0.000000e+00> : vector<16x128xf32>
    %33 = tpu.matmul %30, %32, %cst_13 {dimension_numbers = #tpu.dot_dimension_numbers<[1], [0], [0], [1], [0, 0, 1, 1], [], []>} : vector<16x128xbf16>, vector<128x128xbf16>, vector<16x128xf32> -> vector<16x128xf32>
    %34 = arith.truncf %6 : vector<16x128xf32> to vector<16x128xbf16>
    %c1 = arith.constant 1 : index
    %c0_14 = arith.constant 0 : index
    %c0_15 = arith.constant 0 : index
    %35 = vector.load %arg2[%c1, %c0_14, %c0_15] : memref<2x128x128xbf16, #tpu.memory_space<vmem>>, vector<1x128x128xbf16>
    %36 = vector.shape_cast %35 : vector<1x128x128xbf16> to vector<128x128xbf16>
    %cst_16 = arith.constant dense<0.000000e+00> : vector<16x128xf32>
    %37 = tpu.matmul %34, %36, %cst_16 {dimension_numbers = #tpu.dot_dimension_numbers<[1], [0], [0], [1], [0, 0, 1, 1], [], []>} : vector<16x128xbf16>, vector<128x128xbf16>, vector<16x128xf32> -> vector<16x128xf32>
    %38 = arith.addf %33, %37 : vector<16x128xf32>
    %c0_17 = arith.constant 0 : index
    %c0_18 = arith.constant 0 : index
    %39 = vector.load %arg3[%c0_17, %c0_18] : memref<2x128xf32, #tpu.memory_space<vmem>>, vector<2x128xf32>
    %40 = vector.extract_strided_slice %39 {offsets = [0, 0], sizes = [1, 128], strides = [1, 1]} : vector<2x128xf32> to vector<1x128xf32>
    %41 = vector.extract_strided_slice %39 {offsets = [1, 0], sizes = [1, 128], strides = [1, 1]} : vector<2x128xf32> to vector<1x128xf32>
    %42 = vector.broadcast %20 : vector<16x1xf32> to vector<16x128xf32>
    %43 = vector.broadcast %40 : vector<1x128xf32> to vector<16x128xf32>
    %44 = arith.mulf %42, %43 : vector<16x128xf32>
    %45 = arith.subf %38, %44 : vector<16x128xf32>
    %46 = vector.broadcast %29 : vector<16x1xf32> to vector<16x128xf32>
    %47 = arith.mulf %45, %46 : vector<16x128xf32>
    %48 = vector.broadcast %41 : vector<1x128xf32> to vector<16x128xf32>
    %49 = arith.addf %47, %48 : vector<16x128xf32>
    %c0_19 = arith.constant 0 : index
    %c0_20 = arith.constant 0 : index
    %50 = vector.load %arg4[%c0_19, %c0_20] : memref<16x128xf32, #tpu.memory_space<vmem>>, vector<16x128xf32>
    tpu.vector_store %arg4[%c0_19, %c0_20], %49 {strides = array<i32>} : memref<16x128xf32, #tpu.memory_space<vmem>>, vector<16x128xf32>,
    return
  }
  func.func @transform_0(%arg0: i32) -> (i32, i32, i32, i32) {
    %c0_i32 = arith.constant 0 : i32
    %c0_i32_0 = arith.constant 0 : i32
    %c0_i32_1 = arith.constant 0 : i32
    %c0_i32_2 = arith.constant 0 : i32
    return %arg0, %c0_i32, %c0_i32_0, %c0_i32_1 : i32, i32, i32, i32
  }
  func.func @transform_1(%arg0: i32) -> (i32, i32, i32) {
    %c0_i32 = arith.constant 0 : i32
    %c0_i32_0 = arith.constant 0 : i32
    %c0_i32_1 = arith.constant 0 : i32
    %c0_i32_2 = arith.constant 0 : i32
    return %c0_i32, %c0_i32_0, %c0_i32_1 : i32, i32, i32
  }
  func.func @transform_2(%arg0: i32) -> (i32, i32) {
    %c0_i32 = arith.constant 0 : i32
    %c0_i32_0 = arith.constant 0 : i32
    %c0_i32_1 = arith.constant 0 : i32
    return %c0_i32, %c0_i32_0 : i32, i32
  }
  func.func @transform_3(%arg0: i32) -> (i32, i32) {
    %c0_i32 = arith.constant 0 : i32
    %c0_i32_0 = arith.constant 0 : i32
    return %arg0, %c0_i32 : i32, i32
  }
}

</mosaic_0001>

<bundles_post_ra>
// kernel: patch_merging_forward.1
= control target key start
LH: loop header
LB: loop body
LE: loop exit
PB: predicated region body
PF: predicated region fallthrough
CT: control target
= control target key end

     0   :  { %8 = vsyncpa [#allocation3], 0  ;;  %s960_s0 = inlined_call_operand.vmem [shape: f32[16,2,8,128], index: 0, kind: input, shape index: {}]   ;;  %s961_s1 = inlined_call_operand.vmem [shape: bf16[2,128,128], index: 1, kind: input, shape index: {}]   ;;  %s962_s2 = inlined_call_operand.vmem [shape: f32[2,128], index: 2, kind: input, shape index: {}]   ;;  %s963_s3 = inlined_call_operand.hbm [shape: f32[128,128], index: 3, kind: output, shape index: {}]  }
   0x1   :  { %10 = vsyncpa [#allocation3 + $0x1], 0  ;;  %s785_s12 = smov 0   ;;  %s787_s13 = smov 0  }
   0x2   :  { %s789_s14 = smov 0   ;;  %s791_s15 = smov 0  }
   0x3 LB: > { %s806_s16 = sadd.s32 4294967295, %s758_s15   ;;  %s526_s17 = sadd.s32 4294967294, %s758_s15   ;;  %s758_s15 = sphi %s791_s15, %s969_s15   ;;  %s754_s14 = sphi %s789_s14, %s968_s14   ;;  %s750_s13 = sphi %s787_s13, %s967_s13   ;;  %s746_s12 = sphi %s785_s12, %s966_s12  }
   0x4   : > { %s810_s18 = sadd.s32 1, %s758_s15   ;;  %s91_s19 = sadd.s32 1, %s754_s14 }
   0x5   : > { %s88_s20 = ssub.s32 %s758_s15, %s810_s18  ;;  %p101_p0 = scmp.ne.s32.totalorder %s754_s14, %s750_s13 }
   0x6   : > { %p89_p1 = scmp.eq.s32.totalorder %s88_s20, 0  ;;  %p102_p2 = scmp.eq.s32.totalorder %s806_s16, 7 }
   0x7   : > { %p107_p3 = scmp.ne.s32.totalorder %s750_s13, %s746_s12  ;;  %p108_p4 = scmp.eq.s32.totalorder %s526_s17, 7 }
   0x8   : > { %s821_s21 = scalar_select %p89_p1, %s754_s14, %s91_s19  }
   0x9   : > { %p823_p5 = por %p102_p2, %p101_p0  ;;  %p827_p6 = por %p108_p4, %p107_p3 }
   0xa   : > { %p529_p7 = scmp.ge.s32.totalorder %s758_s15, 1  ;;  %p142_p8 = scmp.lt.s32.totalorder %s758_s15, 9 }
   0xc   : > { %p143_p9 = pnand %p529_p7, %p142_p8 }
   0xd   : > { %v676_v0 = vld [vmem:[%s961_s1 + $0x40] sm:$0xff] (!%p143_p9)   ;;  %v760_v1 = vmov (!%p143_p9), 0.0   ;;  %v678_v3 = vld [vmem:[%s961_s1 + $0x48] sm:$0xff] (!%p143_p9)   ;;  %vm761_vm0 = vmmov (!%p143_p9), 0   ;;  %s531_s30 = sshll.u32 (!%p143_p9), %s806_s16, 1  ;;  %v680_v5 = vld [vmem:[%s961_s1 + $0x50] sm:$0xff] (!%p143_p9)   ;;  %v432_v47 = vlaneseq (!%p143_p9) }
   0xe   : > { %146 = sbr.rel (%p143_p9) target bundleno = 284 (0x11c), region = 32  ;;  %591 = vmatprep.subr.bf16.mxu1 (!%p143_p9), %v760_v1  ;;  %611 = vmatprep.subr.bf16.mxu0 (!%p143_p9), %v760_v1  ;;  %v677_v2 = vld [vmem:[%s961_s1] sm:$0xff] (!%p143_p9)   ;;  %v679_v4 = vld [vmem:[%s961_s1 + $0x8] sm:$0xff] (!%p143_p9)   ;;  %p168_p10 = scmp.lt.s32.totalorder (!%p143_p9), %s531_s30, 15  ;;  %v681_v6 = vld [vmem:[%s961_s1 + $0x10] sm:$0xff] (!%p143_p9)  }
   0xf   : > { %592 = vmatpush3.bf16.msra.mxu1 (!%p143_p9), %v676_v0  ;;  %607 = vmatprep.mubr.msk.bf16.mxu1 (!%p143_p9), %vm761_vm0, %v760_v1  ;;  %v682_v7 = vld [vmem:[%s961_s1 + $0x58] sm:$0xff] (!%p143_p9)   ;;  %v684_v9 = vld [vmem:[%s961_s1 + $0x60] sm:$0xff] (!%p143_p9)   ;;  %v686_v13 = vld [vmem:[%s961_s1 + $0x68] sm:$0xff] (!%p143_p9)   ;;  %v433_v50 = vshrl.u32 (!%p143_p9), %v432_v47, 7  ;;  %s164_s27 = sand.u32 (!%p143_p9), 1, %s750_s13   ;;  %s572_s29 = sshll.u32 (!%p143_p9), %s806_s16, 8 }
  0x10   : > { %612 = vmatpush3.bf16.msra.mxu0 (!%p143_p9), %v677_v2  ;;  %593 = vmatprep.subr.bf16.mxu1 (!%p143_p9), %v760_v1  ;;  %v683_v8 = vld [vmem:[%s961_s1 + $0x18] sm:$0xff] (!%p143_p9)   ;;  %v685_v10 = vld [vmem:[%s961_s1 + $0x20] sm:$0xff] (!%p143_p9)   ;;  %v687_v14 = vld [vmem:[%s961_s1 + $0x28] sm:$0xff] (!%p143_p9)   ;;  %s530_s28 = sshll.u32 (!%p143_p9), %s164_s27, 4  ;;  %s913_s7 = scalar_lea.hbm (!%p143_p9), %s963_s3, %s572_s29 }
  0x11   : > { %613 = vmatprep.subr.bf16.mxu0 (!%p143_p9), %v760_v1  ;;  %627 = vmatprep.mubr.msk.bf16.mxu0 (!%p143_p9), %vm761_vm0, %v760_v1  ;;  %v688_v19 = vld [vmem:[%s961_s1 + $0x70] sm:$0xff] (!%p143_p9)   ;;  %v690_v23 = vld [vmem:[%s961_s1 + $0x78] sm:$0xff] (!%p143_p9)   ;;  %v434_v53 = vsub.s32 (!%p143_p9), 0, %v433_v50  ;;  %v431_v54 = vld [vmem:[%s962_s2] sm:$0x3] (!%p143_p9)  ;;  %v444_v56 = vsub.s32 (!%p143_p9), 1, %v433_v50 }
  0x12   : > { %v689_v20 = vld [vmem:[%s961_s1 + $0x30] sm:$0xff] (!%p143_p9)   ;;  %v691_v24 = vld [vmem:[%s961_s1 + $0x38] sm:$0xff] (!%p143_p9)   ;;  %s919_s16 = scalar_lea.sflag (!%p143_p9), [#allocation3], %s164_s27  ;;  %s762_s9 = smov (!%p143_p9), [#allocation2]  }
  0x13   : > { %594 = vmatpush3.bf16.msra.mxu1 (!%p143_p9), %v678_v3  ;;  %v435_v55 = vrot.slane (!%p143_p9), %v431_v54, %v434_v53  ;;  %v445_v2 = vrot.slane (!%p143_p9), %v431_v54, %v444_v56  ;;  %s700_s10 = sshll.u32 (!%p143_p9), %s762_s9, 4  ;;  %s701_s10 = int_to_ptr.vmem [resolvable:$false] %s700_s10 }
  0x14   : > { %614 = vmatpush3.bf16.msra.mxu0 (!%p143_p9), %v679_v4  ;;  %595 = vmatprep.subr.bf16.mxu1 (!%p143_p9), %v760_v1  ;;  %s702_s11 = scalar_lea.vmem (!%p143_p9), %s701_s10, 512 }
  0x15   : > { %s971_s30 = smov (!%p168_p10, %s531_s30), 15  ;;  %615 = vmatprep.subr.bf16.mxu0 %v760_v1 }
  0x16   : > { %s571_s17 = sshll.u32 %s971_s30, 4  ;;  %s166_s30 = scalar_lea.vmem [#allocation2], %s530_s28 }
  0x17   : > { %596 = vmatpush3.bf16.msra.mxu1 %v680_v5  ;;  %s172_s26 = scalar_lea.vmem %s960_s0, %s571_s17  ;;  %s464_s4 = sshll.u32 %s166_s30, 4  ;;  %s915_s4 = int_to_ptr.vmem [resolvable:$true] %s464_s4 }
  0x18   : > { %616 = vmatpush3.bf16.msra.mxu0 %v681_v6  ;;  %597 = vmatprep.subr.bf16.mxu1 %v760_v1  ;;  %v177_v11 = vld [vmem:[%s172_s26 + $0x8] sm:$0xff]  ;;  %v176_v12 = vld [vmem:[%s172_s26] sm:$0xff]  ;;  %v179_v15 = vld [vmem:[%s172_s26 + $0x18] sm:$0xff]  ;;  %s696_s8 = scalar_lea.vmem %s915_s4, 256  ;;  %p703_p0 = scmp.lt.s32.totalorder %s915_s4, %s701_s10 }
  0x19   : > { %617 = vmatprep.subr.bf16.mxu0 %v760_v1  ;;  %180 = vadd.xlane.f32.xlu0 %v176_v12  ;;  %v178_v16 = vld [vmem:[%s172_s26 + $0x10] sm:$0xff]  ;;  %v190_v17 = vmul.f32 %v176_v12, %v176_v12  ;;  %v196_v21 = vmul.f32 %v177_v11, %v177_v11  ;;  %v197_v22 = vmul.f32 %v179_v15, %v179_v15  ;;  %p697_p11 = scmp.ne.s32.totalorder %s915_s4, %s696_s8  ;;  %p704_p1 = scmp.lt.s32.totalorder %s702_s11, %s696_s8 }
  0x1a   : > { %184 = vadd.xlane.f32.xlu1 %v177_v11  ;;  %v191_v18 = vmul.f32 %v178_v16, %v178_v16  ;;  %v235_v25 = vpack.c.bf16 %v179_v15, %v177_v11  ;;  %v218_v26 = vpack.c.bf16 %v178_v16, %v176_v12 }
  0x1b   : > { %598 = vmatpush3.bf16.msra.mxu1 %v682_v7  ;;  %p698_p12 = pnand %p697_p11, %p823_p5  ;;  %p705_p2 = por %p704_p1, %p703_p0 }
  0x1c   : > { %618 = vmatpush3.bf16.msra.mxu0 %v683_v8  ;;  %599 = vmatprep.subr.bf16.mxu1 %v760_v1 }
  0x1d   : > { %619 = vmatprep.subr.bf16.mxu0 %v760_v1  ;;  %182 = vadd.xlane.f32.xlu0 %v178_v16  ;;  %p699_p13 = pneg %p698_p12 }
  0x1e   : > { %186 = vadd.xlane.f32.xlu1 %v179_v15 }
  0x1f   : > { %600 = vmatpush3.bf16.msra.mxu1 %v684_v9  ;;  %p706_p3 = pnand %p705_p2, %p699_p13 }
  0x20   : > { %620 = vmatpush3.bf16.msra.mxu0 %v685_v10  ;;  %601 = vmatprep.subr.bf16.mxu1 %v760_v1 }
  0x21   : > { %621 = vmatprep.subr.bf16.mxu0 %v760_v1  ;;  %192 = vadd.xlane.f32.xlu0 %v190_v17 }
  0x22   : > { %194 = vadd.xlane.f32.xlu1 %v191_v18 }
  0x23   : > { %602 = vmatpush3.bf16.msra.mxu1 %v686_v13 }
  0x24   : > { %622 = vmatpush3.bf16.msra.mxu0 %v687_v14  ;;  %603 = vmatprep.subr.bf16.mxu1 %v760_v1 }
  0x25   : > { %623 = vmatprep.subr.bf16.mxu0 %v760_v1  ;;  %198 = vadd.xlane.f32.xlu0 %v196_v21 }
  0x26   : > { %200 = vadd.xlane.f32.xlu1 %v197_v22 }
  0x27   : > { %604 = vmatpush3.bf16.msra.mxu1 %v688_v19 }
  0x28   : > { %624 = vmatpush3.bf16.msra.mxu0 %v689_v20  ;;  %605 = vmatprep.subr.bf16.mxu1 %v760_v1 }
  0x29   : > { %625 = vmatprep.subr.bf16.mxu0 %v760_v1 }
  0x2b   : > { %606 = vmatpush3.bf16.msra.mxu1 %v690_v23 }
  0x2c   : > { %626 = vmatpush3.bf16.msra.mxu0 %v691_v24 }
  0x2e   : > { %608 = vmatmul.mubr.bf16.vlgmr.msra.gmra.mrb[0].mxu1 %v235_v25 }
  0x2f   : > { %628 = vmatmul.mubr.bf16.vlgmr.msra.gmra.mrb[0].mxu0 %v218_v26 }
  0xa6   : > { %v181_v27 = vpop.xlane.xlu0 %180 }
  0xa7   : > { %v185_v28 = vpop.xlane.xlu1 %184 }
  0xa8   : > { %v188_v33 = vadd.f32 %v185_v28, %v181_v27 }
  0xaa   : > { %v183_v29 = vpop.xlane.xlu0 %182  ;;  %v204_v37 = vmul.f32 0.00390625, %v188_v33 }
  0xab   : > { %v187_v30 = vpop.xlane.xlu1 %186 }
  0xac   : > { %v189_v35 = vadd.f32 %v187_v30, %v183_v29  ;;  %v208_v41 = vmul.f32 %v204_v37, %v204_v37  ;;  %v436_v60 = vmul.f32 %v435_v55, %v204_v37 }
  0xae   : > { %v193_v31 = vpop.xlane.xlu0 %192  ;;  %v205_v39 = vmul.f32 0.00390625, %v189_v35 }
  0xaf   : > { %v195_v32 = vpop.xlane.xlu1 %194 }
  0xb0   : > { %v209_v43 = vmul.f32 %v205_v39, %v205_v39  ;;  %v437_v3 = vmul.f32 %v435_v55, %v205_v39 }
  0xb2   : > { %v199_v34 = vpop.xlane.xlu0 %198 }
  0xb3   : > { %v201_v36 = vpop.xlane.xlu1 %200  ;;  %v202_v38 = vadd.f32 %v199_v34, %v193_v31 }
  0xb4   : > { %v203_v40 = vadd.f32 %v201_v36, %v195_v32 }
  0xb5   : > { %v206_v42 = vmul.f32 0.00390625, %v202_v38 }
  0xb6   : > { %v207_v44 = vmul.f32 0.00390625, %v203_v40 }
  0xb7   : > { %v210_v45 = vsub.f32 %v206_v42, %v208_v41 }
  0xb8   : > { %v211_v46 = vsub.f32 %v207_v44, %v209_v43 }
  0xb9   : > { %v212_v48 = vmax.f32 %v210_v45, 0.0 }
  0xba   : > { %v213_v49 = vmax.f32 %v211_v46, 0.0 }
  0xbb   : > { %v214_v51 = vadd.f32 1e-05, %v212_v48 }
  0xbc   : > { %v215_v52 = vadd.f32 1e-05, %v213_v49 }
  0xbd   : > { %692 = vrsqrt.f32 %v214_v51 }
  0xbe   : > { %694 = vrsqrt.f32 %v215_v52 }
  0xc7   : > { %v693_v7 = vpop.eup %692 }
  0xc8   : > { %v695_v10 = vpop.eup %694 }
 0x101   : > { %v335_v57 = vpop.f32.mrb[0].mxu1 }
 0x102   : > { %v424_v58 = vpop.f32.mrb[0].mxu0  ;;  %v609_v59 = vpop.f32.mrb[1].mxu1 }
 0x103   : > { %v425_v61 = vadd.f32 %v424_v58, %v335_v57  ;;  %v629_v62 = vpop.f32.mrb[1].mxu0  ;;  %v338_v63 = vpop.f32.mrb[2].mxu1 }
 0x104   : > { %v427_v0 = vpop.f32.mrb[2].mxu0  ;;  %v610_v1 = vpop.f32.mrb[3].mxu1 }
 0x105   : > { %v438_v4 = vsub.f32 %v425_v61, %v436_v60  ;;  %v428_v5 = vadd.f32 %v427_v0, %v338_v63  ;;  %v630_v6 = vpop.f32.mrb[3].mxu0 }
 0x107   : > { %v440_v8 = vmul.f32 %v693_v7, %v438_v4  ;;  %v439_v9 = vsub.f32 %v428_v5, %v437_v3 }
 0x109   : > { %v446_v11 = vadd.f32 %v445_v2, %v440_v8  ;;  %v441_v12 = vmul.f32 %v695_v10, %v439_v9 }
 0x10b   : > { %448 = vst [vmem:[%s166_s30] sm:$0xff] %v446_v11  ;;  %v447_v13 = vadd.f32 %v445_v2, %v441_v12 }
 0x10d   : > { %449 = vst [vmem:[%s166_s30 + $0x8] sm:$0xff] %v447_v13 }
 0x10e   : > { %709 = shalt.err (!%p706_p3)
}
 0x10f   : > { %s710_s17 = scalar_lea.hbm %s913_s7, 256  ;;  %s714_s24 = scalar_lea.hbm %s963_s3, 2048 }
 0x110   : > { %p711_p4 = scmp.ne.s32.totalorder %s913_s7, %s710_s17  ;;  %p715_p9 = scmp.lt.u32.totalorder %s913_s7, %s963_s3 }
 0x111   : > { %p716_p10 = scmp.lt.u32.totalorder %s714_s24, %s710_s17  ;;  %p718_p12 = scmp.lt.u32.totalorder %s710_s17, %s913_s7 }
 0x112   : > { %p712_p7 = pnand %p711_p4, %p823_p5 }
 0x113   : > { %p717_p11 = por %p716_p10, %p715_p9 }
 0x114   : > { %p713_p8 = pneg %p712_p7 }
 0x115   : > { %p719_p13 = por %p718_p12, %p717_p11 }
 0x117   : > { %p720_p0 = pnand %p719_p13, %p713_p8 }
 0x119   : > { %723 = shalt.err (!%p720_p0)
}
 0x11a   : > { %s763_s27 = smov 128   ;;  %s764_s28 = smov 8  }
 0x11b   : > { %633 = dma.vmem_to_hbm [thread:$0]  (%p823_p5), %s915_s4, 256, %s913_s7, %s919_s16, %s763_s27, %s763_s27, %s764_s28  }
 0x11c PF: > { %p639_p1 = scmp.ge.s32.totalorder %s758_s15, 2  ;;  %s479_s29 = sand.u32 1, %s746_s12  }
 0x11d   : > { %s480_s30 = scalar_lea.sflag [#allocation3], %s479_s29 }
 0x11e   : > { %p636_p2 = pnand %p639_p1, %p827_p6 }
 0x120   : > { %741 = dma.done.wait (!%p636_p2), %s480_s30, 256  }
 0x121   : > { %743 = vsyncadd (!%p636_p2), %s480_s30, 4294967040  ;;  %p13_p3 = scmp.ge.s32.totalorder %s810_s18, 10   ;;  %s966_s12 = smov %s750_s13 }
 0x122   : > { %s967_s13 = smov %s754_s14  ;;  %s968_s14 = smov %s821_s21 }
 0x123   : > { %s969_s15 = smov %s810_s18  ;;  %15 = sbr.rel (!%p13_p3) target bundleno = 3 (0x3), region = 68 }
 0x12a   :  { %485 = vsyncpa [#allocation3], 1 }
 0x12b   :  { %487 = vsyncpa [#allocation3 + $0x1], 1 }

</bundles_post_ra>
